<compile_context>
chip_gen: v5e
topology: v5e:2x2
jax: 0.10.0
libtpu: 0.0.40
codegen_flags: <defaults>
</compile_context>

<pallas_src>
import math

import jax
import jax.numpy as jnp
from jax.experimental import pallas as pl
from jax.experimental.pallas import tpu as pltpu


def _round_up(x, m):
    return ((x + m - 1) // m) * m


def _pick_tile(dim_pad, cap, step=128):
    """Largest tile <= cap that exactly divides dim_pad (dim_pad % step == 0)."""
    if dim_pad <= cap:
        return dim_pad
    t = max(step, (cap // step) * step)
    while dim_pad % t:
        t -= step
    return t


def _bitnet_linear_kernel(x_ref, w_ref, b_ref, o_ref, acc_ref):
    k = pl.program_id(2)

    @pl.when(k == 0)
    def _():
        acc_ref[...] = jnp.zeros_like(acc_ref)

    # Weight is pre-transposed to (K, N) in the wrapper, so this is a plain
    # A @ B contraction: pure MXU path, no in-kernel transpose.
    acc_ref[...] += jnp.dot(
        x_ref[...], w_ref[...], preferred_element_type=jnp.float32
    )

    @pl.when(k == pl.num_programs(2) - 1)
    def _():
        o_ref[...] = (acc_ref[...] + b_ref[...]).astype(o_ref.dtype)


def prepare_bitnet_params(weight, bias=None, *, compute_dtype=jnp.bfloat16,
                          tn_cap=512, tk_cap=2048):
    """One-time weight/bias preprocessing (cast, transpose to (K, N), pad).

    Done once at load time, so the cast/pad/transpose is not paid per forward.
    """
    n_out, k_in = weight.shape
    k_pad = _round_up(k_in, 128)
    n_pad = _round_up(n_out, 128)
    tk = _pick_tile(k_pad, tk_cap)
    tn = _pick_tile(n_pad, tn_cap)
    # Expose >= 2 blocks along the (parallel) N axis when possible so v7x's
    # two TensorCores both get work even for single-M-tile (decode) calls.
    if n_pad // tn < 2 and n_pad >= 256:
        tn = _pick_tile(n_pad, max(128, (n_pad // 2) // 128 * 128))

    w_t = jnp.pad(weight.astype(compute_dtype).T,
                  ((0, k_pad - k_in), (0, n_pad - n_out)))
    if bias is None:
        b = jnp.zeros((1, n_pad), jnp.float32)
    else:
        b = jnp.pad(bias.astype(jnp.float32), (0, n_pad - n_out)).reshape(1, n_pad)

    return dict(w_t=w_t, b=b, n_out=n_out, k_in=k_in, tn=tn, tk=tk,
                compute_dtype=compute_dtype)


def bitnet_linear_forward(x, params, *, out_dtype=None, tm_cap=512):
    """out = x @ W.T + bias  (exact eval/forward semantics of BitNetLinearLayer)."""
    w_t, b = params["w_t"], params["b"]
    n_out, k_in = params["n_out"], params["k_in"]
    tn, tk = params["tn"], params["tk"]
    compute_dtype = params["compute_dtype"]

    B, K = x.shape
    assert K == k_in, "in_features mismatch"
    k_pad, n_pad = w_t.shape
    if out_dtype is None:
        out_dtype = x.dtype

    # Activation padding (cheap, per-call): sublane-align M, lane-align K.
    m_pad = _round_up(B, 8)
    tm = min(tm_cap, m_pad)
    m_pad = _round_up(m_pad, tm)

    x_p = x.astype(compute_dtype)
    if (m_pad, k_pad) != (B, K):
        x_p = jnp.pad(x_p, ((0, m_pad - B), (0, k_pad - K)))

    # VMEM budget: double-buffered inputs/bias/output + resident accumulator.
    in_bytes = jnp.dtype(compute_dtype).itemsize
    out_bytes = jnp.dtype(out_dtype).itemsize
    vmem_need = (2 * tm * tk * in_bytes + 2 * tk * tn * in_bytes
                 + 2 * tn * 4 + 2 * tm * tn * out_bytes + tm * tn * 4)
    vmem_limit = int(min(max(vmem_need * 3 // 2, 32 * 1024 * 1024),
                         48 * 1024 * 1024))

    grid = (m_pad // tm, n_pad // tn, k_pad // tk)

    out_p = pl.pallas_call(
        _bitnet_linear_kernel,
        out_shape=jax.ShapeDtypeStruct((m_pad, n_pad), out_dtype),
        grid_spec=pltpu.PrefetchScalarGridSpec(
            num_scalar_prefetch=0,
            grid=grid,
            in_specs=[
                pl.BlockSpec((tm, tk), lambda i, j, k: (i, k)),   # activations
                pl.BlockSpec((tk, tn), lambda i, j, k: (k, j)),   # weight (pre-T)
                pl.BlockSpec((1, tn), lambda i, j, k: (0, j)),    # bias (epilogue)
            ],
            out_specs=pl.BlockSpec((tm, tn), lambda i, j, k: (i, j)),
            scratch_shapes=[pltpu.VMEM((tm, tn), jnp.float32)],
        ),
        compiler_params=pltpu.CompilerParams(
            dimension_semantics=("parallel", "parallel", "arbitrary"),
            vmem_limit_bytes=vmem_limit,
        ),
    )(x_p, w_t, b)

    if (m_pad, n_pad) == (B, n_out):
        return out_p
    return out_p[:B, :n_out]


def make_bitnet_linear(weight, bias=None, *, compute_dtype=jnp.bfloat16,
                       out_dtype=None):
    """Build a jitted forward closure over the pre-processed weight/bias."""
    params = prepare_bitnet_params(weight, bias, compute_dtype=compute_dtype)

    @jax.jit
    def forward(x):
        return bitnet_linear_forward(x, params, out_dtype=out_dtype)

    return forward


if __name__ == "__main__":
    # Small shapes consistent with a Linear layer forward.
    batch = 8
    in_features = 128
    out_features = 64

    key = jax.random.PRNGKey(0)
    k_w, k_b, k_x = jax.random.split(key, 3)

    # Deterministic init mirroring reset_parameters(): uniform(-stdv, stdv).
    stdv = 1.0 / math.sqrt(in_features)
    weight = jax.random.uniform(
        k_w, (out_features, in_features), minval=-stdv, maxval=stdv, dtype=jnp.float32
    )
    bias = jax.random.uniform(
        k_b, (out_features,), minval=-stdv, maxval=stdv, dtype=jnp.float32
    )
    x = jax.random.normal(k_x, (batch, in_features), dtype=jnp.float32)

    # Pure-JAX reference using the literal module formula (the scale factors
    # cancel exactly, but keep them for fidelity of the check).
    waf = 0.0001 + 2.0 * jnp.mean(jnp.abs(weight)) + 0.0001
    ref = (
        waf
        * 127.0
        * jnp.dot(x / 127.0, (weight / waf).T, precision=jax.lax.Precision.HIGHEST)
        + bias
    )

    # f32 streaming path: exact semantics, tight tolerance.
    fwd_f32 = make_bitnet_linear(weight, bias, compute_dtype=jnp.float32)
    out_f32 = jax.block_until_ready(fwd_f32(x))
    assert out_f32.shape == (batch, out_features)
    assert jnp.allclose(out_f32, ref, atol=1e-4, rtol=1e-4)

    # Default (recommended) bf16 streaming path: looser tolerance from input rounding.
    fwd_bf16 = make_bitnet_linear(weight, bias)
    out_bf16 = jax.block_until_ready(fwd_bf16(x))
    assert out_bf16.shape == (batch, out_features)
    assert jnp.allclose(out_bf16, ref, atol=2e-2, rtol=2e-2)

    # Ragged shapes: exercise padding / slicing paths.
    b2, in2, out2 = 5, 100, 70
    w2 = jax.random.uniform(k_w, (out2, in2), minval=-0.1, maxval=0.1, dtype=jnp.float32)
    bi2 = jax.random.uniform(k_b, (out2,), minval=-0.1, maxval=0.1, dtype=jnp.float32)
    x2 = jax.random.normal(k_x, (b2, in2), dtype=jnp.float32)
    out2_k = jax.block_until_ready(
        make_bitnet_linear(w2, bi2, compute_dtype=jnp.float32)(x2)
    )
    ref2 = jnp.dot(x2, w2.T, precision=jax.lax.Precision.HIGHEST) + bi2
    assert out2_k.shape == (b2, out2)
    assert jnp.allclose(out2_k, ref2, atol=1e-4, rtol=1e-4)

    print("KERNEL_OK")
</pallas_src>

<mosaic_0001>
module attributes {stable_mosaic.version = 11 : i64} {
  func.func @_bitnet_linear_kernel(%arg0: i32, %arg1: i32, %arg2: i32, %arg3: memref<8x128xf32, #tpu.memory_space<vmem>>, %arg4: memref<128x128xf32, #tpu.memory_space<vmem>>, %arg5: memref<1x128xf32, #tpu.memory_space<vmem>>, %arg6: memref<8x128xf32, #tpu.memory_space<vmem>>, %arg7: memref<8x128xf32, #tpu.memory_space<vmem>>) attributes {dimension_semantics = [#tpu.dimension_semantics<parallel>, #tpu.dimension_semantics<parallel>, #tpu.dimension_semantics<arbitrary>], iteration_bounds = array<i64: 1, 1, 1>, scalar_prefetch = 0 : i64, scratch_operands = 1 : i64, tpu.core_type = #tpu.core_type<tc>, window_params = [{transform_indices = @transform_0, window_bounds = array<i64: 8, 128>}, {transform_indices = @transform_1, window_bounds = array<i64: 128, 128>}, {transform_indices = @transform_2, window_bounds = array<i64: 1, 128>}, {transform_indices = @transform_3, window_bounds = array<i64: 8, 128>}]} {
    %c0_i32 = arith.constant 0 : i32
    %0 = arith.cmpi eq, %arg2, %c0_i32 : i32
    %1 = arith.extui %0 : i1 to i32
    %c0_i32_0 = arith.constant 0 : i32
    %2 = arith.cmpi ne, %1, %c0_i32_0 : i32
    scf.if %2 {
      %cst_10 = arith.constant 0.000000e+00 : f32
      %12 = vector.broadcast %cst_10 : f32 to vector<8x128xf32>
      %c0_11 = arith.constant 0 : index
      %c0_12 = arith.constant 0 : index
      %13 = vector.load %arg7[%c0_11, %c0_12] : memref<8x128xf32, #tpu.memory_space<vmem>>, vector<8x128xf32>
      tpu.vector_store %arg7[%c0_11, %c0_12], %12 {strides = array<i32>} : memref<8x128xf32, #tpu.memory_space<vmem>>, vector<8x128xf32>,
    } else {
    }
    %c0 = arith.constant 0 : index
    %c0_1 = arith.constant 0 : index
    %3 = vector.load %arg7[%c0, %c0_1] : memref<8x128xf32, #tpu.memory_space<vmem>>, vector<8x128xf32>
    %c0_2 = arith.constant 0 : index
    %c0_3 = arith.constant 0 : index
    %4 = vector.load %arg3[%c0_2, %c0_3] : memref<8x128xf32, #tpu.memory_space<vmem>>, vector<8x128xf32>
    %c0_4 = arith.constant 0 : index
    %c0_5 = arith.constant 0 : index
    %5 = vector.load %arg4[%c0_4, %c0_5] : memref<128x128xf32, #tpu.memory_space<vmem>>, vector<128x128xf32>
    %cst = arith.constant dense<0.000000e+00> : vector<8x128xf32>
    %6 = tpu.matmul %4, %5, %cst {dimension_numbers = #tpu.dot_dimension_numbers<[1], [0], [0], [1], [0, 0, 1, 1], [], []>} : vector<8x128xf32>, vector<128x128xf32>, vector<8x128xf32> -> vector<8x128xf32>
    %7 = arith.addf %3, %6 : vector<8x128xf32>
    %c0_6 = arith.constant 0 : index
    %c0_7 = arith.constant 0 : index
    %8 = vector.load %arg7[%c0_6, %c0_7] : memref<8x128xf32, #tpu.memory_space<vmem>>, vector<8x128xf32>
    tpu.vector_store %arg7[%c0_6, %c0_7], %7 {strides = array<i32>} : memref<8x128xf32, #tpu.memory_space<vmem>>, vector<8x128xf32>,
    %c0_i32_8 = arith.constant 0 : i32
    %9 = arith.cmpi eq, %arg2, %c0_i32_8 : i32
    %10 = arith.extui %9 : i1 to i32
    %c0_i32_9 = arith.constant 0 : i32
    %11 = arith.cmpi ne, %10, %c0_i32_9 : i32
    scf.if %11 {
      %c0_10 = arith.constant 0 : index
      %c0_11 = arith.constant 0 : index
      %12 = vector.load %arg7[%c0_10, %c0_11] : memref<8x128xf32, #tpu.memory_space<vmem>>, vector<8x128xf32>
      %c0_12 = arith.constant 0 : index
      %c0_13 = arith.constant 0 : index
      %13 = vector.load %arg5[%c0_12, %c0_13] : memref<1x128xf32, #tpu.memory_space<vmem>>, vector<1x128xf32>
      %14 = vector.broadcast %13 : vector<1x128xf32> to vector<8x128xf32>
      %15 = arith.addf %12, %14 : vector<8x128xf32>
      %c0_14 = arith.constant 0 : index
      %c0_15 = arith.constant 0 : index
      %16 = vector.load %arg6[%c0_14, %c0_15] : memref<8x128xf32, #tpu.memory_space<vmem>>, vector<8x128xf32>
      tpu.vector_store %arg6[%c0_14, %c0_15], %15 {strides = array<i32>} : memref<8x128xf32, #tpu.memory_space<vmem>>, vector<8x128xf32>,
    } else {
    }
    return
  }
  func.func @transform_0(%arg0: i32, %arg1: i32, %arg2: i32) -> (i32, i32) {
    %c0_i32 = arith.constant 0 : i32
    return %arg0, %arg2 : i32, i32
  }
  func.func @transform_1(%arg0: i32, %arg1: i32, %arg2: i32) -> (i32, i32) {
    %c0_i32 = arith.constant 0 : i32
    return %arg2, %arg1 : i32, i32
  }
  func.func @transform_2(%arg0: i32, %arg1: i32, %arg2: i32) -> (i32, i32) {
    %c0_i32 = arith.constant 0 : i32
    %c0_i32_0 = arith.constant 0 : i32
    return %c0_i32, %arg1 : i32, i32
  }
  func.func @transform_3(%arg0: i32, %arg1: i32, %arg2: i32) -> (i32, i32) {
    %c0_i32 = arith.constant 0 : i32
    return %arg0, %arg1 : i32, i32
  }
}

</mosaic_0001>

<bundles_post_ra>
// kernel: forward.1
= control target key start
LH: loop header
LB: loop body
LE: loop exit
PB: predicated region body
PF: predicated region fallthrough
CT: control target
= control target key end

     0   :  { %8 = vsyncpa [#allocation4], 0  ;;  %s239_s0 = inlined_call_operand.hbm [shape: f32[8,128], index: 0, kind: input, shape index: {}]   ;;  %s240_s1 = inlined_call_operand.hbm [shape: f32[128,128], index: 1, kind: input, shape index: {}]   ;;  %s241_s2 = inlined_call_operand.vmem [shape: f32[1,128], index: 2, kind: input, shape index: {}]   ;;  %s242_s3 = inlined_call_operand.hbm [shape: f32[8,128], index: 3, kind: output, shape index: {}]  }
   0x1   :  { %9 = vsyncpa [#allocation7], 0 }
   0x2   :  { %10 = vsyncpa [#allocation5], 0  ;;  %s16_s14 = sshll.u32 %s239_s0, 4  ;;  %s202_s15 = smov [#allocation3]   ;;  %s17_s14 = int_to_ptr.hbm [resolvable:$true] %s16_s14 }
   0x3   :  { %s18_s16 = sshll.u32 %s202_s15, 4  ;;  %s26_s19 = sshll.u32 %s240_s1, 4  ;;  %s19_s16 = int_to_ptr.vmem [resolvable:$true] %s18_s16  ;;  %s27_s19 = int_to_ptr.hbm [resolvable:$true] %s26_s19 }
   0x4   :  { %21 = dma.hbm_to_vmem [thread:$0]  %s17_s14, 128, %s19_s16, [#allocation4]  }
   0x5   :  { %s203_s20 = smov [#allocation6]   ;;  %s204_s22 = smov 128  }
   0x6   :  { %s28_s21 = sshll.u32 %s203_s20, 4  ;;  %s205_s23 = smov 8   ;;  %s29_s21 = int_to_ptr.vmem [resolvable:$true] %s28_s21 }
   0x7   :  { %34 = dma.hbm_to_vmem [thread:$0]  %s27_s19, 2048, %s29_s21, [#allocation7], %s204_s22, %s204_s22, %s205_s23  }
   0x8   :  { %196 = dma.done.wait [#allocation4], 128  }
   0x9   :  { %197 = vsyncadd [#allocation4], 4294967168 }
   0xa   :  { %198 = dma.done.wait [#allocation7], 2048  }
   0xb   :  { %199 = vsyncadd [#allocation7], 4294965248  ;;  %v67_v0 = vld [vmem:[#allocation6 + $0x78] sm:$0xff]  ;;  %v66_v1 = vld [vmem:[#allocation6 + $0x70] sm:$0xff]  ;;  %s206_s24 = smov [#allocation8]   ;;  %s107_s28 = sshll.u32 %s242_s3, 4  ;;  %s108_s28 = int_to_ptr.hbm [resolvable:$true] %s107_s28 }
   0xc   :  { %68 = vmatpush.msra.mxu0 %v67_v0  ;;  %v65_v2 = vld [vmem:[#allocation6 + $0x68] sm:$0xff]  ;;  %v64_v3 = vld [vmem:[#allocation6 + $0x60] sm:$0xff]  ;;  %v63_v4 = vld [vmem:[#allocation6 + $0x58] sm:$0xff]  ;;  %s105_s25 = sshll.u32 %s206_s24, 4  ;;  %s106_s25 = int_to_ptr.vmem [resolvable:$true] %s105_s25 }
   0xd   :  { %v62_v5 = vld [vmem:[#allocation6 + $0x50] sm:$0xff]  ;;  %v61_v6 = vld [vmem:[#allocation6 + $0x48] sm:$0xff]  ;;  %v60_v7 = vld [vmem:[#allocation6 + $0x40] sm:$0xff] }
   0xe   :  { %69 = vmatpush.msra.mxu0 %v66_v1  ;;  %v59_v8 = vld [vmem:[#allocation6 + $0x38] sm:$0xff]  ;;  %v58_v9 = vld [vmem:[#allocation6 + $0x30] sm:$0xff]  ;;  %v57_v10 = vld [vmem:[#allocation6 + $0x28] sm:$0xff] }
   0xf   :  { %v56_v11 = vld [vmem:[#allocation6 + $0x20] sm:$0xff]  ;;  %v55_v12 = vld [vmem:[#allocation6 + $0x18] sm:$0xff]  ;;  %v54_v13 = vld [vmem:[#allocation6 + $0x10] sm:$0xff] }
  0x10   :  { %70 = vmatpush.msra.mxu0 %v65_v2  ;;  %v53_v14 = vld [vmem:[#allocation6 + $0x8] sm:$0xff]  ;;  %v52_v15 = vld [vmem:[#allocation6] sm:$0xff]  ;;  %v51_v16 = vld [vmem:[#allocation3] sm:$0xff] }
  0x11   :  { %v123_v17 = vld [vmem:[%s241_s2] ss:$0 sm:$0xff] }
  0x12   :  { %71 = vmatpush.msra.mxu0 %v64_v3 }
  0x14   :  { %72 = vmatpush.msra.mxu0 %v63_v4 }
  0x16   :  { %73 = vmatpush.msra.mxu0 %v62_v5 }
  0x18   :  { %74 = vmatpush.msra.mxu0 %v61_v6 }
  0x1a   :  { %75 = vmatpush.msra.mxu0 %v60_v7 }
  0x1c   :  { %76 = vmatpush.msra.mxu0 %v59_v8 }
  0x1e   :  { %77 = vmatpush.msra.mxu0 %v58_v9 }
  0x20   :  { %78 = vmatpush.msra.mxu0 %v57_v10 }
  0x22   :  { %79 = vmatpush.msra.mxu0 %v56_v11 }
  0x24   :  { %80 = vmatpush.msra.mxu0 %v55_v12 }
  0x26   :  { %81 = vmatpush.msra.mxu0 %v54_v13 }
  0x28   :  { %82 = vmatpush.msra.mxu0 %v53_v14 }
  0x2a   :  { %83 = vmatpush.msra.mxu0 %v52_v15 }
  0x2b   :  { %84 = vmatmul.f32.vlgmr.msra.gmra.mxu0 %v51_v16 }
  0xa8   :  { %v85_v18 = vpop.f32.mrf.mxu0 }
  0xa9   :  { %v98_v19 = vadd.f32 %v123_v17, %v85_v18 }
  0xab   :  { %99 = vst [vmem:[#allocation8] sm:$0xff] %v98_v19 }
  0xac   :  { %110 = dma.vmem_to_hbm [thread:$0]  %s106_s25, 128, %s108_s28, [#allocation5]  }
  0xad   :  { %200 = dma.done.wait [#allocation5], 128  }
  0xae   :  { %201 = vsyncadd [#allocation5], 4294967168 }
  0xaf   :  { %115 = vsyncpa [#allocation4], 1 }
  0xb0   :  { %116 = vsyncpa [#allocation7], 1 }
  0xb1   :  { %117 = vsyncpa [#allocation5], 1 }

</bundles_post_ra>
